<compile_context>
chip_gen: v7x
topology: tpu7x:2x2x1
jax: 0.10.0
libtpu: 0.0.40
codegen_flags: <defaults>
</compile_context>

<pallas_src>
import functools

import jax
import jax.numpy as jnp
from jax import lax
from jax.experimental import pallas as pl
from jax.experimental.pallas import tpu as pltpu


# ----------------------------------------------------------------------------
# Weight packing layouts / tap plans
# ----------------------------------------------------------------------------
def _s2_compact(cin):
    # compact packing only pays off once the per-phase channel slices are wide
    # enough to keep the MXU K dimension filled.
    return cin >= 64


def _s2_layout(compact):
    """Tap plan (in units of cin) + packing order for a 3x3/stride-2 conv on a
    space-to-depth (phase-major (py,px,c)) input.

    plan groups: (ox, ((oy, ch_start, ch_len, k_off), ...))   [units of cin]
    blocks:      one (dy,dx) original tap (or None = zeros) per cin-row block
                 of the packed (K, cout) weight, in k order.
    """
    if compact:
        # total K = 9*cin  (no zero-phase MACs)
        groups = (
            (0, ((0, 0, 4, 0), (1, 0, 2, 4))),
            (1, ((0, 0, 1, 6), (0, 2, 1, 7), (1, 0, 1, 8))),
        )
        blocks = [(0, 0), (0, 1), (1, 0), (1, 1),
                  (2, 0), (2, 1),
                  (0, 2), (1, 2), (2, 2)]
    else:
        # zero-padded 4-phase taps, total K = 16*cin (kept for tiny cin where
        # sub-cin lane slices would underfill the MXU anyway)
        groups = (
            (0, ((0, 0, 4, 0), (1, 0, 4, 4))),
            (1, ((0, 0, 4, 8), (1, 0, 4, 12))),
        )
        blocks = []
        for ox in range(2):
            for oy in range(2):
                for py in range(2):
                    for px in range(2):
                        dy, dx = 2 * oy + py, 2 * ox + px
                        blocks.append((dy, dx) if (dy < 3 and dx < 3) else None)
    return groups, blocks


def _plan_s2(cin, compact):
    groups, _ = _s2_layout(compact)
    scaled = tuple(
        (ox, tuple((oy, cs * cin, cl * cin, ko * cin) for oy, cs, cl, ko in segs))
        for ox, segs in groups)
    return (1, scaled)          # max row offset = 1 (2x2 taps in s2d domain)


def _pack_w_s2(w, compact):
    """(3,3,cin,cout) HWIO -> packed (K, cout) bf16 matching _plan_s2."""
    _, _, cin, cout = w.shape
    _, blocks = _s2_layout(compact)
    mats = [jnp.zeros((cin, cout), w.dtype) if blk is None else w[blk[0], blk[1]]
            for blk in blocks]
    return jnp.concatenate(mats, axis=0).astype(jnp.bfloat16)


def _plan_s1(cin):
    groups, k = [], 0
    for ox in range(3):
        segs = []
        for oy in range(3):
            segs.append((oy, 0, cin, k))
            k += cin
        groups.append((ox, tuple(segs)))
    return (2, tuple(groups))   # max row offset = 2 (3x3 taps)


def _pack_w_s1(w):
    """(3,3,cin,cout) HWIO -> (9*cin, cout) bf16 in (ox-outer, oy-inner) order."""
    mats = [w[oy, ox] for ox in range(3) for oy in range(3)]
    return jnp.concatenate(mats, axis=0).astype(jnp.bfloat16)


# ----------------------------------------------------------------------------
# Pallas kernel: fused, row-tiled, im2col-free convolution
# ----------------------------------------------------------------------------
def _conv_kernel(*refs, n_in, plans, th, wo, relu, has_res, has_head):
    """For each (channel-split) input: hoist one column view per dx shift,
    then accumulate one bf16 MXU matmul per (dy, channel-segment) into an f32
    accumulator.  Bias, ReLU, the optional residual add and the optional fused
    1x1 head run in the f32 epilogue before the single cast + store."""
    xs = refs[:n_in]
    ws = refs[n_in:2 * n_in]
    i = 2 * n_in
    bias_ref = refs[i]; i += 1
    res_ref = None
    if has_res:
        res_ref = refs[i]; i += 1
    hw_ref = hb_ref = None
    if has_head:
        hw_ref, hb_ref = refs[i], refs[i + 1]; i += 2
    out_ref = refs[i]

    r = pl.program_id(1)
    base = pl.multiple_of(r * th, th)
    cout = bias_ref.shape[-1]
    m = th * wo

    acc = jnp.zeros((m, cout), jnp.float32)
    for x_ref, w_ref, (max_oy, groups) in zip(xs, ws, plans):
        c_in = x_ref.shape[-1]
        rows = th + max_oy
        for ox, segs in groups:
            # one (relayouting) W-shift per dx; dy offsets below are cheap
            # leading-dim row slices of the flattened column view.
            col = x_ref[0, pl.ds(base, rows), pl.ds(ox, wo), :]
            col = col.reshape(rows * wo, c_in)
            for oy, cs, cl, ko in segs:
                a = col[oy * wo:oy * wo + m, cs:cs + cl]
                acc = acc + jnp.dot(a, w_ref[ko:ko + cl, :],
                                    preferred_element_type=jnp.float32)

    y = acc + bias_ref[...]
    if relu:
        y = jnp.maximum(y, 0.0)
    if has_head:
        nclass = out_ref.shape[-1]
        logits = jnp.dot(y, hw_ref[...], preferred_element_type=jnp.float32)
        logits = logits + hb_ref[...]
        out_ref[0] = logits.reshape(th, wo, nclass).astype(out_ref.dtype)
    else:
        y = y.reshape(th, wo, cout)
        if has_res:
            y = y + res_ref[0].astype(jnp.float32)
        out_ref[0] = y.astype(out_ref.dtype)


def _pick_th(ho, wo, cmax, target_bytes=2 * 1024 * 1024):
    """Largest power-of-two row tile whose f32 working set is ~<= target."""
    th = ho
    while th % 2 == 0 and th // 2 >= 8 and th * wo * cmax * 4 > target_bytes:
        th //= 2
    return th


def _conv_call(inputs, bias, ho, wo, *, relu, residual=None, head=None,
               out_dtype=jnp.bfloat16, force_th=None):
    """inputs: list of (x, w2d, plan); x:(N,Hx,Wx,Cx) bf16 (already padded /
    space-to-depth'ed), w2d:(K,Cout) bf16 packed tap slabs.  Multiple inputs
    accumulate into the same output (fused channel concat)."""
    n_in = len(inputs)
    n = inputs[0][0].shape[0]
    cout = bias.shape[-1]
    out_c = head[0].shape[-1] if head is not None else cout

    cmax = max(cout, sum(x.shape[-1] for x, _, _ in inputs))
    th = force_th if force_th is not None else _pick_th(ho, wo, cmax)
    assert ho % th == 0, (ho, th)
    n_row = ho // th

    args, in_specs = [], []
    for x, _, _ in inputs:
        _, hx, wx, cx = x.shape
        args.append(x)
        # full (padded) image resident per batch index; constant along the row
        # axis so it is DMA'd once per image while row tiles stream through.
        in_specs.append(pl.BlockSpec((1, hx, wx, cx), lambda i, r: (i, 0, 0, 0)))
    for _, w2d, _ in inputs:
        k, _ = w2d.shape
        args.append(w2d)
        # TODO(synk): request single-buffering for these constant weight slabs
        # (pipeline_mode) to halve weight VMEM on v7x.
        in_specs.append(pl.BlockSpec((k, cout), lambda i, r: (0, 0)))
    args.append(bias)
    in_specs.append(pl.BlockSpec((1, cout), lambda i, r: (0, 0)))
    if residual is not None:
        args.append(residual)
        in_specs.append(pl.BlockSpec((1, th, wo, cout), lambda i, r: (i, r, 0, 0)))
    if head is not None:
        hw, hb = head
        args.append(hw)
        in_specs.append(pl.BlockSpec(hw.shape, lambda i, r: (0, 0)))
        args.append(hb)
        in_specs.append(pl.BlockSpec(hb.shape, lambda i, r: (0, 0)))

    kernel = functools.partial(
        _conv_kernel, n_in=n_in, plans=tuple(p for _, _, p in inputs),
        th=th, wo=wo, relu=relu,
        has_res=residual is not None, has_head=head is not None)

    return pl.pallas_call(
        kernel,
        out_shape=jax.ShapeDtypeStruct((n, ho, wo, out_c), out_dtype),
        grid_spec=pltpu.PrefetchScalarGridSpec(
            num_scalar_prefetch=0,
            grid=(n, n_row),
            in_specs=in_specs,
            out_specs=pl.BlockSpec((1, th, wo, out_c),
                                   lambda i, r: (i, r, 0, 0)),
        ),
        compiler_params=pltpu.CompilerParams(
            dimension_semantics=("parallel", "parallel"),
            vmem_limit_bytes=64 * 1024 * 1024),
    )(*args)


# ----------------------------------------------------------------------------
# Conv wrappers (thin XLA glue: pad / space-to-depth / nearest-upsample only)
# ----------------------------------------------------------------------------
def _space_to_depth2(x):
    n, h, w, c = x.shape
    x = x.reshape(n, h // 2, 2, w // 2, 2, c)
    x = jnp.transpose(x, (0, 1, 3, 2, 4, 5))
    return x.reshape(n, h // 2, w // 2, 4 * c)


def conv3x3_s2(x, w2d, b, *, relu=True, residual=None, out_dtype=jnp.bfloat16,
               force_th=None):
    """3x3 / stride-2 / pad-1 conv; stride folded through space-to-depth so the
    kernel only sees unit-stride taps; compact weight packing for cin>=64."""
    # TODO(synk): build pad + space-to-depth inside the kernel (VMEM scratch)
    # to remove this XLA-side HBM round trip of the activation.
    cin = x.shape[-1]
    xp = jnp.pad(x, ((0, 0), (1, 1), (1, 1), (0, 0)))
    xs = _space_to_depth2(xp)
    ho, wo = x.shape[1] // 2, x.shape[2] // 2
    plan = _plan_s2(cin, _s2_compact(cin))
    return _conv_call([(xs, w2d, plan)], b, ho, wo, relu=relu,
                      residual=residual, out_dtype=out_dtype, force_th=force_th)


def conv3x3_s1(inputs, b, *, relu=True, head=None, out_dtype=jnp.bfloat16,
               force_th=None):
    """3x3 / stride-1 / pad-1 conv over one or more channel-split inputs
    (each (x, w2d) pair accumulates into the same output = fused concat).
    `head=(hw, hb)` fuses a trailing 1x1 conv into the epilogue."""
    ho, wo = inputs[0][0].shape[1], inputs[0][0].shape[2]
    ins = []
    for x, w2d in inputs:
        xp = jnp.pad(x, ((0, 0), (1, 1), (1, 1), (0, 0)))
        ins.append((xp, w2d, _plan_s1(x.shape[-1])))
    return _conv_call(ins, b, ho, wo, relu=relu, head=head,
                      out_dtype=out_dtype, force_th=force_th)


def upsample2x_nearest(x):
    # TODO(synk): fold the nearest 2x upsample into the following conv's
    # row/col indexing instead of materializing the 4x tensor in HBM.
    x = jnp.repeat(x, 2, axis=1)
    return jnp.repeat(x, 2, axis=2)


# ----------------------------------------------------------------------------
# Model (synthetic Encoder / CondGenerator / Decoder matching forward() shapes)
# ----------------------------------------------------------------------------
def encoder(p, x):
    h = conv3x3_s2(x, *p["e1a"])            # H/2 ,  32
    f1 = conv3x3_s2(h, *p["e1b"])           # H/4 ,  64
    f2 = conv3x3_s2(f1, *p["e2"])           # H/8 , 128
    f3 = conv3x3_s2(f2, *p["e3"])           # H/16, 256
    f4 = conv3x3_s2(f3, *p["e4"])           # H/32, 512
    return f1, f2, f3, f4


def generator(p, f1, feat4):
    h = conv3x3_s2(f1, *p["g1"])            # H/8 , 128
    h = conv3x3_s2(h, *p["g2"])             # H/16, 256
    # g3 (no ReLU); `gen_out + feat4` residual fused into the epilogue.
    return conv3x3_s2(h, *p["g3"], relu=False, residual=feat4)  # H/32, 512


def decoder(p, f1, f2, f3, f4):
    h = conv3x3_s1([(upsample2x_nearest(f4), p["d3_up"]), (f3, p["d3_sk"])],
                   p["d3_b"])                                   # H/16, 256
    h = conv3x3_s1([(upsample2x_nearest(h), p["d2_up"]), (f2, p["d2_sk"])],
                   p["d2_b"])                                   # H/8 , 128
    # d1 with the 5-class 1x1 head fused into its epilogue.
    return conv3x3_s1([(upsample2x_nearest(h), p["d1_up"]), (f1, p["d1_sk"])],
                      p["d1_b"], head=(p["head_w"], p["head_b"]),
                      out_dtype=jnp.float32)                    # H/4 , 5


@jax.jit
def cond_uda_forward(params, real_A, real_B):
    """Reproduces CondUDAModel.forward():
       feat1..4 = encoder(A); feat4 = generator(feat1) + feat4;
       out = interp(decoder([feat1..4])); feat4_B = encoder(B)[3]."""
    nA = real_A.shape[0]
    xA = jnp.transpose(real_A, (0, 2, 3, 1)).astype(jnp.bfloat16)
    xB = jnp.transpose(real_B, (0, 2, 3, 1)).astype(jnp.bfloat16)

    if xA.shape == xB.shape:
        # Single batched encoder pass over [A; B]: encoder weights fetched once
        # and the GEMM M doubled on the small deep layers.
        f1, f2, f3, f4 = encoder(params, jnp.concatenate([xA, xB], axis=0))
        f1A, f2A, f3A, f4A = f1[:nA], f2[:nA], f3[:nA], f4[:nA]
        f4B = f4[nA:]
    else:
        f1A, f2A, f3A, f4A = encoder(params, xA)
        f4B = encoder(params, xB)[3]

    feat4 = generator(params, f1A, f4A)           # gen_out + feat4 (fused)
    out = decoder(params, f1A, f2A, f3A, feat4)   # (nA, H/4, W/4, 5) f32

    # self.interp: bilinear, align_corners=False (half-pixel centers) ==
    # jax.image.resize 'bilinear' for upsampling.
    H, W = real_A.shape[2], real_A.shape[3]
    out = jax.image.resize(out, (nA, H, W, out.shape[-1]), method="bilinear")

    return (jnp.transpose(out, (0, 3, 1, 2)),
            jnp.transpose(feat4.astype(jnp.float32), (0, 3, 1, 2)),
            jnp.transpose(f4B.astype(jnp.float32), (0, 3, 1, 2)))


# ----------------------------------------------------------------------------
# Deterministic parameter init (weights pre-packed once for the kernels)
# ----------------------------------------------------------------------------
def _he_w(key, kh, kw, cin, cout):
    w = jax.random.normal(key, (kh, kw, cin, cout), jnp.float32)
    return w * jnp.sqrt(2.0 / (kh * kw * cin))


def _prep_b(cout):
    return jnp.zeros((1, cout), jnp.float32)


def _s2_layer(key, cin, cout):
    return (_pack_w_s2(_he_w(key, 3, 3, cin, cout), _s2_compact(cin)),
            _prep_b(cout))


def init_params(key):
    ks = jax.random.split(key, 15)
    return {
        # Encoder: five 3x3 stride-2 convs.
        "e1a": _s2_layer(ks[0], 3, 32),
        "e1b": _s2_layer(ks[1], 32, 64),
        "e2":  _s2_layer(ks[2], 64, 128),
        "e3":  _s2_layer(ks[3], 128, 256),
        "e4":  _s2_layer(ks[4], 256, 512),
        # CondGenerator(scale=32): feat1 -> feat4 shape.
        "g1":  _s2_layer(ks[5], 64, 128),
        "g2":  _s2_layer(ks[6], 128, 256),
        "g3":  _s2_layer(ks[7], 256, 512),
        # Decoder(5): channel-split (fused concat) stride-1 convs + fused head.
        "d3_up": _pack_w_s1(_he_w(ks[8], 3, 3, 512, 256)),
        "d3_sk": _pack_w_s1(_he_w(ks[9], 3, 3, 256, 256)),
        "d3_b": _prep_b(256),
        "d2_up": _pack_w_s1(_he_w(ks[10], 3, 3, 256, 128)),
        "d2_sk": _pack_w_s1(_he_w(ks[11], 3, 3, 128, 128)),
        "d2_b": _prep_b(128),
        "d1_up": _pack_w_s1(_he_w(ks[12], 3, 3, 128, 64)),
        "d1_sk": _pack_w_s1(_he_w(ks[13], 3, 3, 64, 64)),
        "d1_b": _prep_b(64),
        "head_w": _he_w(ks[14], 1, 1, 64, 5)[0, 0],   # (64, 5) f32
        "head_b": _prep_b(5),
    }


# ----------------------------------------------------------------------------
# Self-check of the packed-tap kernels against lax.conv (tiny shapes)
# ----------------------------------------------------------------------------
def _self_check(key):
    k = jax.random.split(key, 8)

    def ref_conv(x, w, stride):
        return lax.conv_general_dilated(
            x, w.astype(jnp.bfloat16), window_strides=(stride, stride),
            padding=((1, 1), (1, 1)),
            dimension_numbers=("NHWC", "HWIO", "NHWC"),
            preferred_element_type=jnp.float32)

    def check(a, b, name):
        err = float(jnp.max(jnp.abs(a - b)))
        scale = float(jnp.max(jnp.abs(b))) + 1e-6
        assert err <= 0.1 * scale, f"{name}: err={err} scale={scale}"

    b = 0.1 * jax.random.normal(k[2], (1, 32), jnp.float32)

    # stride-2, compact packing (cin >= 64), row-tiled (2 row tiles)
    x = jax.random.normal(k[0], (2, 16, 16, 64), jnp.float32).astype(jnp.bfloat16)
    w = _he_w(k[1], 3, 3, 64, 32)
    got = conv3x3_s2(x, _pack_w_s2(w, _s2_compact(64)), b,
                     out_dtype=jnp.float32, force_th=4)
    ref = jnp.maximum(ref_conv(x, w, 2) + b.reshape(1, 1, 1, -1), 0.0)
    check(got, ref, "conv3x3_s2(compact)")

    # stride-2, zero-padded phase packing (cin < 64)
    x = jax.random.normal(k[3], (2, 16, 16, 16), jnp.float32).astype(jnp.bfloat16)
    w = _he_w(k[4], 3, 3, 16, 32)
    got = conv3x3_s2(x, _pack_w_s2(w, _s2_compact(16)), b, out_dtype=jnp.float32)
    ref = jnp.maximum(ref_conv(x, w, 2) + b.reshape(1, 1, 1, -1), 0.0)
    check(got, ref, "conv3x3_s2(padded)")

    # stride-1, fused two-input (channel concat) conv, row-tiled
    x1 = jax.random.normal(k[5], (2, 16, 16, 32), jnp.float32).astype(jnp.bfloat16)
    x2 = jax.random.normal(k[6], (2, 16, 16, 16), jnp.float32).astype(jnp.bfloat16)
    w1 = _he_w(k[7], 3, 3, 32, 32)
    w2 = _he_w(k[0], 3, 3, 16, 32)
    got = conv3x3_s1([(x1, _pack_w_s1(w1)), (x2, _pack_w_s1(w2))], b,
                     out_dtype=jnp.float32, force_th=8)
    ref = jnp.maximum(ref_conv(x1, w1, 1) + ref_conv(x2, w2, 1)
                      + b.reshape(1, 1, 1, -1), 0.0)
    check(got, ref, "conv3x3_s1(fused)")


# TODO(synk): FCDiscriminator / BCEWithLogits / cross-entropy losses, optimizers
# and data loaders are training-only and not part of forward(); not implemented.

if __name__ == "__main__":
    key = jax.random.PRNGKey(0)
    kp, ka, kb, kc = jax.random.split(key, 4)

    params = init_params(kp)
    # small input consistent with the module: NCHW, spatial divisible by 32
    real_A = jax.random.normal(ka, (2, 3, 64, 64), jnp.float32)
    real_B = jax.random.normal(kb, (2, 3, 64, 64), jnp.float32)

    _self_check(kc)

    out, feat4, feat4_B = cond_uda_forward(params, real_A, real_B)
    jax.block_until_ready((out, feat4, feat4_B))

    assert out.shape == (2, 5, 64, 64), out.shape
    assert feat4.shape == (2, 512, 2, 2), feat4.shape
    assert feat4_B.shape == (2, 512, 2, 2), feat4_B.shape
    print("KERNEL_OK")
</pallas_src>

<mosaic_0001>
module attributes {stable_mosaic.version = 11 : i64} {
  func.func @_conv_kernel(%arg0: i32, %arg1: i32, %arg2: memref<1x9x9x256xbf16, #tpu.memory_space<vmem>>, %arg3: memref<576x32xbf16, #tpu.memory_space<vmem>>, %arg4: memref<1x32xf32, #tpu.memory_space<vmem>>, %arg5: memref<1x4x8x32xf32, #tpu.memory_space<vmem>>) attributes {dimension_semantics = [#tpu.dimension_semantics<parallel>, #tpu.dimension_semantics<parallel>], iteration_bounds = array<i64: 2, 2>, scalar_prefetch = 0 : i64, scratch_operands = 0 : i64, tpu.core_type = #tpu.core_type<tc>, window_params = [{transform_indices = @transform_0, window_bounds = array<i64: 1, 9, 9, 256>}, {pipeline_mode = #tpu.pipeline_mode<synchronous>, transform_indices = @transform_1, window_bounds = array<i64: 576, 32>}, {pipeline_mode = #tpu.pipeline_mode<synchronous>, transform_indices = @transform_2, window_bounds = array<i64: 1, 32>}, {transform_indices = @transform_3, window_bounds = array<i64: 1, 4, 8, 32>}]} {
    %c4_i32 = arith.constant 4 : i32
    %0 = arith.muli %arg1, %c4_i32 : i32
    %1 = tpu.assume_multiple %0, 4 : i32
    %cst = arith.constant 0.000000e+00 : f32
    %2 = vector.broadcast %cst : f32 to vector<32x32xf32>
    %c0 = arith.constant 0 : index
    %3 = arith.index_cast %1 : i32 to index
    %c0_0 = arith.constant 0 : index
    %c0_1 = arith.constant 0 : index
    %4 = vector.load %arg2[%c0, %3, %c0_0, %c0_1] : memref<1x9x9x256xbf16, #tpu.memory_space<vmem>>, vector<1x5x8x256xbf16>
    %5 = vector.shape_cast %4 : vector<1x5x8x256xbf16> to vector<5x8x256xbf16>
    %6 = vector.shape_cast %5 : vector<5x8x256xbf16> to vector<40x256xbf16>
    %7 = vector.extract_strided_slice %6 {offsets = [0, 0], sizes = [32, 256], strides = [1, 1]} : vector<40x256xbf16> to vector<32x256xbf16>
    %c0_2 = arith.constant 0 : index
    %c0_3 = arith.constant 0 : index
    %8 = vector.load %arg3[%c0_2, %c0_3] : memref<576x32xbf16, #tpu.memory_space<vmem>>, vector<256x32xbf16>
    %cst_4 = arith.constant dense<0.000000e+00> : vector<32x32xf32>
    %9 = tpu.matmul %7, %8, %cst_4 {dimension_numbers = #tpu.dot_dimension_numbers<[1], [0], [0], [1], [0, 0, 1, 1], [], []>} : vector<32x256xbf16>, vector<256x32xbf16>, vector<32x32xf32> -> vector<32x32xf32>
    %10 = arith.addf %2, %9 : vector<32x32xf32>
    %11 = vector.extract_strided_slice %6 {offsets = [8, 0], sizes = [32, 128], strides = [1, 1]} : vector<40x256xbf16> to vector<32x128xbf16>
    %c256 = arith.constant 256 : index
    %c0_5 = arith.constant 0 : index
    %12 = vector.load %arg3[%c256, %c0_5] : memref<576x32xbf16, #tpu.memory_space<vmem>>, vector<128x32xbf16>
    %cst_6 = arith.constant dense<0.000000e+00> : vector<32x32xf32>
    %13 = tpu.matmul %11, %12, %cst_6 {dimension_numbers = #tpu.dot_dimension_numbers<[1], [0], [0], [1], [0, 0, 1, 1], [], []>} : vector<32x128xbf16>, vector<128x32xbf16>, vector<32x32xf32> -> vector<32x32xf32>
    %14 = arith.addf %10, %13 : vector<32x32xf32>
    %c0_7 = arith.constant 0 : index
    %15 = arith.index_cast %1 : i32 to index
    %c1 = arith.constant 1 : index
    %c0_8 = arith.constant 0 : index
    %16 = vector.load %arg2[%c0_7, %15, %c1, %c0_8] : memref<1x9x9x256xbf16, #tpu.memory_space<vmem>>, vector<1x5x8x256xbf16>
    %17 = vector.shape_cast %16 : vector<1x5x8x256xbf16> to vector<5x8x256xbf16>
    %18 = vector.shape_cast %17 : vector<5x8x256xbf16> to vector<40x256xbf16>
    %19 = vector.extract_strided_slice %18 {offsets = [0, 0], sizes = [32, 64], strides = [1, 1]} : vector<40x256xbf16> to vector<32x64xbf16>
    %c384 = arith.constant 384 : index
    %c0_9 = arith.constant 0 : index
    %20 = vector.load %arg3[%c384, %c0_9] : memref<576x32xbf16, #tpu.memory_space<vmem>>, vector<64x32xbf16>
    %cst_10 = arith.constant dense<0.000000e+00> : vector<32x32xf32>
    %21 = tpu.matmul %19, %20, %cst_10 {dimension_numbers = #tpu.dot_dimension_numbers<[1], [0], [0], [1], [0, 0, 1, 1], [], []>} : vector<32x64xbf16>, vector<64x32xbf16>, vector<32x32xf32> -> vector<32x32xf32>
    %22 = arith.addf %14, %21 : vector<32x32xf32>
    %23 = vector.extract_strided_slice %18 {offsets = [0, 128], sizes = [32, 64], strides = [1, 1]} : vector<40x256xbf16> to vector<32x64xbf16>
    %c448 = arith.constant 448 : index
    %c0_11 = arith.constant 0 : index
    %24 = vector.load %arg3[%c448, %c0_11] : memref<576x32xbf16, #tpu.memory_space<vmem>>, vector<64x32xbf16>
    %cst_12 = arith.constant dense<0.000000e+00> : vector<32x32xf32>
    %25 = tpu.matmul %23, %24, %cst_12 {dimension_numbers = #tpu.dot_dimension_numbers<[1], [0], [0], [1], [0, 0, 1, 1], [], []>} : vector<32x64xbf16>, vector<64x32xbf16>, vector<32x32xf32> -> vector<32x32xf32>
    %26 = arith.addf %22, %25 : vector<32x32xf32>
    %27 = vector.extract_strided_slice %18 {offsets = [8, 0], sizes = [32, 64], strides = [1, 1]} : vector<40x256xbf16> to vector<32x64xbf16>
    %c512 = arith.constant 512 : index
    %c0_13 = arith.constant 0 : index
    %28 = vector.load %arg3[%c512, %c0_13] : memref<576x32xbf16, #tpu.memory_space<vmem>>, vector<64x32xbf16>
    %cst_14 = arith.constant dense<0.000000e+00> : vector<32x32xf32>
    %29 = tpu.matmul %27, %28, %cst_14 {dimension_numbers = #tpu.dot_dimension_numbers<[1], [0], [0], [1], [0, 0, 1, 1], [], []>} : vector<32x64xbf16>, vector<64x32xbf16>, vector<32x32xf32> -> vector<32x32xf32>
    %30 = arith.addf %26, %29 : vector<32x32xf32>
    %c0_15 = arith.constant 0 : index
    %c0_16 = arith.constant 0 : index
    %31 = vector.load %arg4[%c0_15, %c0_16] : memref<1x32xf32, #tpu.memory_space<vmem>>, vector<1x32xf32>
    %32 = vector.broadcast %31 : vector<1x32xf32> to vector<32x32xf32>
    %33 = arith.addf %30, %32 : vector<32x32xf32>
    %cst_17 = arith.constant 0.000000e+00 : f32
    %34 = vector.broadcast %cst_17 : f32 to vector<32x32xf32>
    %35 = arith.maximumf %33, %34 : vector<32x32xf32>
    %36 = vector.shape_cast %35 : vector<32x32xf32> to vector<4x8x32xf32>
    %c0_18 = arith.constant 0 : index
    %c0_19 = arith.constant 0 : index
    %c0_20 = arith.constant 0 : index
    %c0_21 = arith.constant 0 : index
    %37 = vector.load %arg5[%c0_18, %c0_19, %c0_20, %c0_21] : memref<1x4x8x32xf32, #tpu.memory_space<vmem>>, vector<1x4x8x32xf32>
    %38 = vector.shape_cast %37 : vector<1x4x8x32xf32> to vector<4x8x32xf32>
    %39 = vector.shape_cast %36 : vector<4x8x32xf32> to vector<1x4x8x32xf32>
    tpu.vector_store %arg5[%c0_18, %c0_19, %c0_20, %c0_21], %39 {strides = array<i32>} : memref<1x4x8x32xf32, #tpu.memory_space<vmem>>, vector<1x4x8x32xf32>,
    return
  }
  func.func @transform_0(%arg0: i32, %arg1: i32) -> (i32, i32, i32, i32) {
    %c0_i32 = arith.constant 0 : i32
    %c0_i32_0 = arith.constant 0 : i32
    %c0_i32_1 = arith.constant 0 : i32
    %c0_i32_2 = arith.constant 0 : i32
    return %arg0, %c0_i32, %c0_i32_0, %c0_i32_1 : i32, i32, i32, i32
  }
  func.func @transform_1(%arg0: i32, %arg1: i32) -> (i32, i32) {
    %c0_i32 = arith.constant 0 : i32
    %c0_i32_0 = arith.constant 0 : i32
    %c0_i32_1 = arith.constant 0 : i32
    return %c0_i32, %c0_i32_0 : i32, i32
  }
  func.func @transform_2(%arg0: i32, %arg1: i32) -> (i32, i32) {
    %c0_i32 = arith.constant 0 : i32
    %c0_i32_0 = arith.constant 0 : i32
    %c0_i32_1 = arith.constant 0 : i32
    return %c0_i32, %c0_i32_0 : i32, i32
  }
  func.func @transform_3(%arg0: i32, %arg1: i32) -> (i32, i32, i32, i32) {
    %c0_i32 = arith.constant 0 : i32
    %c0_i32_0 = arith.constant 0 : i32
    %c0_i32_1 = arith.constant 0 : i32
    return %arg0, %arg1, %c0_i32, %c0_i32_0 : i32, i32, i32, i32
  }
}

</mosaic_0001>

<bundles_post_ra>
// kernel: tpu_custom_call.1
= control target key start
LH: loop header
LB: loop body
LE: loop exit
PB: predicated region body
PF: predicated region fallthrough
CT: control target
= control target key end

     0   :  { %s2061_s0 = inlined_call_operand.hbm [shape: bf16[2,9,9,256], index: 0, kind: input, shape index: {}]   ;;  %s2062_s1 = inlined_call_operand.hbm [shape: bf16[576,32], index: 1, kind: input, shape index: {}]   ;;  %s2063_s2 = inlined_call_operand.hbm [shape: f32[1,32], index: 2, kind: input, shape index: {}]   ;;  %s2064_s3 = inlined_call_operand.hbm [shape: f32[2,8,8,32], index: 3, kind: output, shape index: {}]  }
   0x1   :  { %2074 = sst [smem:[#allocation16_spill]] %s2062_s1 }
   0x2   :  { %2075 = sst [smem:[#allocation17_spill]] %s2063_s2 }
   0x3   :  { %8 = vsyncpa [#allocation3], 0 }
   0x4   :  { %10 = vsyncpa [#allocation3 + $0x1], 0 }
   0x5   :  { %11 = vsyncpa [#allocation6], 0 }
   0x6   :  { %12 = vsyncpa [#allocation4], 0 }
   0x7   :  { %14 = vsyncpa [#allocation4 + $0x1], 0  ;;  %s1696_s12 = smov 0   ;;  %s1698_s13 = smov 0  }
   0x8   :  { %s1700_s14 = smov 0   ;;  %s1702_s15 = smov 0  }
   0x9   :  { %s1704_s16 = smov 0   ;;  %s1706_s17 = smov 0  }
   0xa   :  { %s1708_s18 = smov 0   ;;  %s1710_s19 = smov 0  }
   0xb   :  { %s1712_s20 = smov 0   ;;  %s1714_s21 = smov 0  }
   0xc   :  { %s1716_s22 = smov 0  }
   0xd LB: > { %2076 = sst [smem:[#allocation12_spill]] %s1624_s12  ;;  %s1073_s23 = sadd.s32 4294967295, %s1664_s22   ;;  %s1664_s22 = sphi %s1716_s22, %s20_s22   ;;  %s1660_s21 = sphi %s1714_s21, %s2109_s21   ;;  %s1656_s20 = sphi %s1712_s20, %s2101_s20   ;;  %s1652_s19 = sphi %s1710_s19, %s2108_s19   ;;  %s1648_s18 = sphi %s1708_s18, %s2100_s18   ;;  %s1644_s17 = sphi %s1706_s17, %s2107_s17   ;;  %s1640_s16 = sphi %s1704_s16, %s2106_s16   ;;  %s1636_s15 = sphi %s1702_s15, %s2105_s15   ;;  %s1632_s14 = sphi %s1700_s14, %s2104_s14   ;;  %s1628_s13 = sphi %s1698_s13, %s2103_s13   ;;  %s1624_s12 = sphi %s1696_s12, %s2102_s12  }
   0xe   : > { %2077 = sst [smem:[#allocation13_spill]] %s1656_s20  ;;  %s1074_s24 = sadd.s32 4294967294, %s1664_s22  }
   0xf   : > { %p52_p0 = scmp.ne.s32.totalorder %s1640_s16, %s1636_s15  ;;  %p1752_p1 = scmp.eq.s32.totalorder %s1073_s23, 0 }
  0x10   : > { %p119_p2 = scmp.ne.s32.totalorder %s1632_s14, %s1628_s13  ;;  %p120_p4 = scmp.eq.s32.totalorder %s1073_s23, 3 }
  0x11   : > { %s2078_s25 = scalar_select %p1752_p1, 1, 0 }
  0x12   : > { %p1761_p3 = por %p1752_p1, %p52_p0  ;;  %p125_p5 = scmp.ne.s32.totalorder %s1628_s13, %s1624_s12 }
  0x13   : > { %p126_p6 = scmp.eq.s32.totalorder %s1074_s24, 3  ;;  %p1767_p7 = por %p120_p4, %p119_p2 }
  0x14   : > { %s2079_s27 = scalar_select %p1761_p3, 1, 0 }
  0x15   : > { %s2080_s28 = scalar_select %p1767_p7, 1, 0 }
  0x16   : > { %p1075_p8 = scmp.ge.s32.totalorder %s1664_s22, 1  ;;  %p1772_p9 = por %p126_p6, %p125_p5 }
  0x17   : > { %p133_p10 = scmp.lt.s32.totalorder %s1664_s22, 5  ;;  %s1666_s4 = smov [#allocation5]  }
  0x18   : > { %s2081_s29 = scalar_select %p1772_p9, 1, 0 }
  0x19   : > { %p1777_p11 = pnand %p1075_p8, %p133_p10  ;;  %s145_s5 = sshll.u32 %s1666_s4, 4  ;;  %s146_s5 = int_to_ptr.vmem [resolvable:$true] %s145_s5 }
  0x1a   : > { %2082 = sst [smem:[#allocation14_spill]] %s2081_s29  ;;  %s1667_s7 = smov [#allocation7]  }
  0x1b   : > { %s2083_s30 = scalar_select %p1777_p11, 1, 0 }
  0x1c   : > { %p1293_p12 = pneg %p1777_p11  ;;  %s159_s8 = sshll.u32 %s1667_s7, 4  ;;  %s1789_s8 = int_to_ptr.vmem [resolvable:$true] %s159_s8 }
  0x1d   : > { %s2085_s1 = sld [smem:[#allocation16_spill]] }
  0x1e   : > { %p1785_p13 = pnand %p1293_p12, %p1752_p1 }
  0x20   : > { %p1454_p2 = pneg %p1785_p13 }
  0x23   : > { %s1452_s11 = scalar_lea.hbm %s2085_s1, 4608 }
  0x24   : > { %p1453_p0 = scmp.ne.s32.totalorder %s2085_s1, %s1452_s11  ;;  %p1459_p6 = scmp.lt.u32.totalorder %s1452_s11, %s2085_s1 }
  0x26   : > { %p1455_p4 = pnand %p1454_p2, %p1453_p0 }
  0x28   : > { %p1456_p5 = pneg %p1455_p4 }
  0x2a   : > { %p1461_p8 = pnand %p1459_p6, %p1456_p5 }
  0x2c   : > { %1464 = shalt.err (!%p1461_p8)
}
  0x2d   : > { %s1465_s7 = scalar_lea.vmem %s146_s5, 4608  ;;  %p1473_p7 = scmp.lt.s32.totalorder %s146_s5, %s146_s5 }
  0x2e   : > { %p1466_p10 = scmp.ne.s32.totalorder %s146_s5, %s1465_s7  ;;  %p1474_p1 = scmp.lt.s32.totalorder %s1465_s7, %s1465_s7 }
  0x30   : > { %p1468_p12 = pnand %p1466_p10, %p1454_p2  ;;  %p1475_p3 = por %p1474_p1, %p1473_p7 }
  0x32   : > { %p1469_p9 = pneg %p1468_p12 }
  0x34   : > { %p1476_p11 = pnand %p1475_p3, %p1469_p9 }
  0x36   : > { %1479 = shalt.err (!%p1476_p11)
}
  0x37   : > { %s1668_s9 = smov 64   ;;  %s1669_s10 = smov 4  }
  0x38   : > { %1296 = dma.hbm_to_vmem [thread:$0]  (!%p1785_p13), %s2085_s1, 4608, %s146_s5, [#allocation6], %s1668_s9, %s1668_s9, %s1669_s10  }
  0x39   : > { %s2086_s2 = sld [smem:[#allocation17_spill]] }
  0x3f   : > { %s1480_s4 = scalar_lea.hbm %s2086_s2, 16 }
  0x40   : > { %p1481_p0 = scmp.ne.s32.totalorder %s2086_s2, %s1480_s4  ;;  %p1487_p7 = scmp.lt.u32.totalorder %s1480_s4, %s2086_s2 }
  0x42   : > { %p1483_p1 = pnand %p1481_p0, %p1454_p2 }
  0x44   : > { %p1484_p3 = pneg %p1483_p1 }
  0x46   : > { %p1489_p9 = pnand %p1487_p7, %p1484_p3 }
  0x48   : > { %1492 = shalt.err (!%p1489_p9)
}
  0x49   : > { %s1493_s5 = scalar_lea.vmem %s1789_s8, 16  ;;  %s1500_s26 = scalar_lea.vmem %s1789_s8, 32 }
  0x4a   : > { %p1494_p11 = scmp.ne.s32.totalorder %s1789_s8, %s1493_s5  ;;  %p1501_p6 = scmp.lt.s32.totalorder %s1789_s8, %s1789_s8 }
  0x4b   : > { %p1502_p8 = scmp.lt.s32.totalorder %s1500_s26, %s1493_s5 }
  0x4c   : > { %p1496_p4 = pnand %p1494_p11, %p1454_p2 }
  0x4d   : > { %p1503_p10 = por %p1502_p8, %p1501_p6 }
  0x4e   : > { %p1497_p5 = pneg %p1496_p4 }
  0x50   : > { %p1504_p12 = pnand %p1503_p10, %p1497_p5 }
  0x52   : > { %1507 = shalt.err (!%p1504_p12)
}
  0x53   : > { %1299 = dma.hbm_to_vmem [thread:$0]  (!%p1785_p13), %s2086_s2, 16, %s1789_s8, [#allocation6]  }
  0x54   : > { %s29_s9 = sadd.s32 1, %s1656_s20  ;;  %s32_s10 = sadd.s32 1, %s1660_s21 }
  0x55   : > { %p30_p2 = scmp.ge.s32.totalorder %s29_s9, 2  ;;  %s39_s6 = sadd.s32 1, %s1644_s17 }
  0x56   : > { %p46_p0 = scmp.ne.s32.totalorder %s1644_s17, %s1640_s16  ;;  %p47_p1 = scmp.eq.s32.totalorder %s1664_s22, 0 }
  0x57   : > { %s2111_s9 = smov (%p30_p2, %s29_s9), 0  ;;  %s2113_s10 = smov (!%p30_p2, %s32_s10), %s1660_s21 }
  0x58   : > { %2087 = sst [smem:[#allocation15_spill]] %s2111_s9  ;;  %p1848_p3 = por %p47_p1, %p46_p0 }
  0x59   : > { %s105_s15 = ssub.s32 %s1656_s20, %s2111_s9  ;;  %p34_p13 = scmp.ge.s32.totalorder %s2113_s10, 2 }
  0x5a   : > { %p1310_p7 = scmp.lt.s32.totalorder %s1664_s22, 4  ;;  %s170_s8 = sand.u32 1, %s1644_s17  }
  0x5b   : > { %s1279_s23 = smul.u32 2304, %s1660_s21  ;;  %s2115_s10 = smov (%p34_p13, %s2113_s10), 0 }
  0x5c   : > { %s1278_s24 = smul.u32 144, %s170_s8  ;;  %s36_s4 = ssub.s32 %s1660_s21, %s2115_s10 }
  0x5d   : > { %s1864_s26 = scalar_lea.hbm %s2061_s0, %s1279_s23  ;;  %p37_p9 = scmp.eq.s32.totalorder %s36_s4, 0 }
  0x5e   : > { %s106_s12 = sor.u32 %s105_s15, %s36_s4  ;;  %s2089_s1 = sadd.s32 1, %s1632_s14 }
  0x5f   : > { %p107_p11 = scmp.eq.s32.totalorder %s106_s12, 0  ;;  %s174_s9 = scalar_lea.vmem [#allocation2], %s1278_s24 }
  0x60   : > { %s1867_s29 = scalar_select %p37_p9, %s1644_s17, %s39_s6  }
  0x61   : > { %s1872_s2 = scalar_select %p107_p11, %s1632_s14, %s2089_s1  }
  0x62   : > { %s181_s20 = sshll.u32 %s174_s9, 4  ;;  %p1878_p4 = pnand %p1310_p7, %p1848_p3  ;;  %s1882_s20 = int_to_ptr.vmem [resolvable:$true] %s181_s20 }
  0x63   : > { %s1884_s15 = scalar_lea.sflag [#allocation3], %s170_s8  ;;  %s1508_s6 = scalar_lea.hbm %s1864_s26, 2304 }
  0x64   : > { %p1509_p5 = scmp.ne.s32.totalorder %s1864_s26, %s1508_s6  ;;  %p1510_p6 = pneg %p1878_p4 }
  0x65   : > { %s1513_s11 = scalar_lea.hbm %s2061_s0, 4608  ;;  %p1514_p12 = scmp.lt.u32.totalorder %s1864_s26, %s2061_s0 }
  0x66   : > { %p1511_p8 = pnand %p1510_p6, %p1509_p5  ;;  %p1515_p2 = scmp.lt.u32.totalorder %s1513_s11, %s1508_s6 }
  0x67   : > { %p1517_p1 = scmp.lt.u32.totalorder %s1508_s6, %s1864_s26 }
  0x68   : > { %p1512_p10 = pneg %p1511_p8  ;;  %p1516_p0 = por %p1515_p2, %p1514_p12 }
  0x6a   : > { %p1518_p3 = por %p1517_p1, %p1516_p0 }
  0x6c   : > { %p1519_p13 = pnand %p1518_p3, %p1512_p10 }
  0x6e   : > { %1522 = shalt.err (!%p1519_p13)
}
  0x6f   : > { %s1523_s8 = scalar_lea.vmem %s1882_s20, 2304  ;;  %s1670_s4 = smov [#allocation2]  }
  0x70   : > { %p1524_p7 = scmp.ne.s32.totalorder %s1882_s20, %s1523_s8  ;;  %s1528_s5 = sshll.u32 %s1670_s4, 4  ;;  %s1529_s5 = int_to_ptr.vmem [resolvable:$false] %s1528_s5 }
  0x71   : > { %s1530_s12 = scalar_lea.vmem %s1529_s5, 4608  ;;  %p1531_p5 = scmp.lt.s32.totalorder %s1882_s20, %s1529_s5 }
  0x72   : > { %p1526_p9 = pnand %p1524_p7, %p1510_p6  ;;  %p1532_p8 = scmp.lt.s32.totalorder %s1530_s12, %s1523_s8 }
  0x74   : > { %p1527_p11 = pneg %p1526_p9  ;;  %p1533_p12 = por %p1532_p8, %p1531_p5 }
  0x76   : > { %p1534_p2 = pnand %p1533_p12, %p1527_p11 }
  0x78   : > { %1537 = shalt.err (!%p1534_p2)
}
  0x79   : > { %s1671_s6 = smov 128   ;;  %s1672_s1 = smov 8  }
  0x7a   : > { %1303 = dma.hbm_to_vmem [thread:$0]  (!%p1878_p4), %s1864_s26, 2304, %s1882_s20, %s1884_s15, %s1671_s6, %s1671_s6, %s1672_s1  }
  0x7b   : > { %p2091_p6 = scmp.ne.s32.totalorder %s2083_s30, 0 }
  0x7c   : > { %s195_s9 = sand.u32 (!%p2091_p6), 1, %s1640_s16   ;;  %p2092_p10 = scmp.ne.s32.totalorder (!%p2091_p6), %s2079_s27, 0 }
  0x7d   : > { %193 = sbr.rel (%p2091_p6) target bundleno = 437 (0x1b5), region = 32  ;;  %s196_s23 = scalar_lea.sflag (!%p2091_p6), [#allocation3], %s195_s9 }
  0x7e   : > { %s1915_s11 = smul.u32 (!%p2091_p6), 144, %s195_s9 }
  0x80   : > { %s199_s24 = scalar_lea.vmem (!%p2091_p6), [#allocation2], %s1915_s11 }
  0x84   : > { %1611 = dma.done.wait (%p2092_p10), %s196_s23, 2304  }
  0x85   : > { %1613 = vsyncadd (%p2092_p10), %s196_s23, 4294964992  ;;  %p2093_p0 = scmp.ne.s32.totalorder %s2078_s25, 0 }
  0x87   : > { %1615 = dma.done.wait (%p2093_p0), [#allocation6], 4624  }
  0x88   : > { %1617 = vsyncadd (%p2093_p0), [#allocation6], 4294962672  ;;  %v1410_v0 = vld [vmem:[#allocation5 + $0x80] sm:$0xff]   ;;  %v1413_v3 = vld [vmem:[#allocation5 + $0x88] sm:$0xff]   ;;  %s1149_s20 = sshll.u32 %s1648_s18, 6  ;;  %vm678_vm2 = vcmask 523264  }
  0x89   : > { %v1411_v1 = vld [vmem:[#allocation5 + $0x40] sm:$0xff]   ;;  %1206 = vmatprep.subr.bf16.mxu0 %v1410_v0  ;;  %v1414_v4 = vld [vmem:[#allocation5 + $0x48] sm:$0xff]   ;;  %v1416_v6 = vld [vmem:[#allocation5 + $0x90] sm:$0xff]   ;;  %s1929_s25 = scalar_lea.vmem %s199_s24, %s1149_s20 [#allocation2]  ;;  %vm567_vm0 = vsmask.f32 3328  ;;  %s227_s27 = sand.u32 1, %s1628_s13  }
  0x8a   : > { %v1412_v2 = vld [vmem:[#allocation5] sm:$0xff]   ;;  %1160 = vmatprep.subr.bf16.mxu1 %v1411_v1  ;;  %1207 = vmatpush3.bf16.msra.mxu0 %v1410_v0  ;;  %v1415_v5 = vld [vmem:[#allocation5 + $0x8] sm:$0xff]   ;;  %v1417_v7 = vld [vmem:[#allocation5 + $0x50] sm:$0xff]   ;;  %vm568_vm1 = vsmask.f32 7440  ;;  %s1143_s30 = sshll.u32 %s1648_s18, 2 }
  0x8b   : > { %1161 = vmatpush3.bf16.msra.mxu1 %v1412_v2  ;;  %1208 = vmatprep.subr.bf16.mxu0 %v1413_v3  ;;  %v1418_v8 = vld [vmem:[#allocation5 + $0x10] sm:$0xff]   ;;  %v1419_v9 = vld [vmem:[#allocation5 + $0x98] sm:$0xff]   ;;  %v1422_v12 = vld [vmem:[#allocation5 + $0xa0] sm:$0xff]   ;;  %s1144_s26 = sshll.u32 %s1652_s19, 3  ;;  %s1083_s7 = sshll.u32 %s227_s27, 5  ;;  %vm944_vm4 = vcmask 261120  }
  0x8c   : > { %1162 = vmatprep.subr.bf16.mxu1 %v1414_v4  ;;  %v1420_v10 = vld [vmem:[#allocation5 + $0x58] sm:$0xff]   ;;  %v1423_v13 = vld [vmem:[#allocation5 + $0x60] sm:$0xff]   ;;  %v1425_v15 = vld [vmem:[#allocation5 + $0xa8] sm:$0xff]   ;;  %s962_s15 = sadd.s32 %s1144_s26, %s1143_s30  ;;  %s229_s8 = scalar_lea.vmem [#allocation8], %s1083_s7 }
  0x8d   : > { %v1421_v11 = vld [vmem:[#allocation5 + $0x18] sm:$0xff]   ;;  %v1424_v14 = vld [vmem:[#allocation5 + $0x20] sm:$0xff]   ;;  %v1426_v16 = vld [vmem:[#allocation5 + $0x68] sm:$0xff]   ;;  %s965_s4 = sshll.u32 %s229_s8, 4  ;;  %s1145_s18 = sshll.u32 %s962_s15, 7  ;;  %s1988_s4 = int_to_ptr.vmem [resolvable:$true] %s965_s4 }
  0x8e   : > { %1209 = vmatpush3.bf16.msra.mxu0 %v1413_v3  ;;  %v1427_v17 = vld [vmem:[#allocation5 + $0x28] sm:$0xff]   ;;  %v1428_v18 = vld [vmem:[#allocation5 + $0xb0] sm:$0xff]   ;;  %v1431_v21 = vld [vmem:[#allocation5 + $0xb8] sm:$0xff]   ;;  %s1994_s12 = scalar_lea.hbm %s2064_s3, %s1145_s18  ;;  %s2000_s6 = scalar_lea.sflag [#allocation4], %s227_s27 }
  0x8f   : > { %1163 = vmatpush3.bf16.msra.mxu1 %v1415_v5  ;;  %1210 = vmatprep.subr.bf16.mxu0 %v1416_v6  ;;  %v1429_v19 = vld [vmem:[#allocation5 + $0x70] sm:$0xff]   ;;  %v1933_v23 = vld [vmem:[%s1929_s25 + $0x20] sm:$0xff]  ;;  %v1432_v25 = vld [vmem:[#allocation5 + $0x78] sm:$0xff]   ;;  %s1538_s1 = scalar_lea.vmem %s1988_s4, 512  ;;  %p2096_p1 = scmp.ne.s32.totalorder %s2080_s28, 0 }
  0x90   : > { %1164 = vmatprep.subr.bf16.mxu1 %v1417_v7  ;;  %v1430_v20 = vld [vmem:[#allocation5 + $0x30] sm:$0xff]   ;;  %v236_v24 = vld [vmem:[%s1929_s25] sm:$0xff]  ;;  %v1433_v29 = vld [vmem:[#allocation5 + $0x38] sm:$0xff]   ;;  %v599_v52 = vshrl.u32 %v1933_v23, 16  ;;  %v602_v59 = vshll.u32 %v1933_v23, 16  ;;  %p1539_p4 = scmp.ne.s32.totalorder %s1988_s4, %s1538_s1  ;;  %s1673_s9 = smov [#allocation8]  }
  0x91   : > { %v237_v22 = vld [vmem:[%s1929_s25 + $0x10] sm:$0xff]  ;;  %v571_v28 = vshrl.u32 %v236_v24, 16  ;;  %v574_v31 = vshll.u32 %v236_v24, 16  ;;  %v1941_v32 = vld [vmem:[%s1929_s25 + $0x40] sm:$0xff]  ;;  %v1440_v42 = vld [vmem:[#allocation5 + $0xc8] sm:$0xff]   ;;  %s1542_s11 = sshll.u32 %s1673_s9, 4  ;;  %s1543_s11 = int_to_ptr.vmem [resolvable:$false] %s1542_s11 }
  0x92   : > { %1211 = vmatpush3.bf16.msra.mxu0 %v1416_v6  ;;  %v1087_v26 = vcombine.low %v237_v22, %v1933_v23  ;;  %v1098_v27 = vcombine.high %v236_v24, %v237_v22  ;;  %v1938_v30 = vld [vmem:[%s1929_s25 + $0x30] sm:$0xff]  ;;  %v1439_v34 = vld [vmem:[#allocation5 + $0xe0] sm:$0xff]   ;;  %v585_v37 = vshrl.u32 %v237_v22, 16  ;;  %v588_v40 = vshll.u32 %v237_v22, 16  ;;  %v1441_v44 = vld [vmem:[#allocation5 + $0xe8] sm:$0xff]   ;;  %p1540_p3 = pnand %p1539_p4, %p2096_p1  ;;  %s1544_s23 = scalar_lea.vmem %s1543_s11, 1024 }
  0x93   : > { %1165 = vmatpush3.bf16.msra.mxu1 %v1418_v8  ;;  %1212 = vmatprep.subr.bf16.mxu0 %v1419_v9  ;;  %v573_v33 = vrot.slane %v571_v28, 4  ;;  %v576_v35 = vrot.slane %v574_v31, 5  ;;  %v1438_v36 = vld [vmem:[#allocation5 + $0xc0] sm:$0xff]   ;;  %v1088_v38 = vcombine.low %v1938_v30, %v1941_v32  ;;  %v1097_v41 = vcombine.low %v236_v24, %v237_v22  ;;  %v558_v46 = vld [vmem:[%s1929_s25 + $0x8] sm:$0x11]  ;;  %v1444_v53 = vld [vmem:[#allocation5 + $0xd0] sm:$0xff]   ;;  %p1545_p7 = scmp.lt.s32.totalorder %s1988_s4, %s1543_s11  ;;  %p1546_p9 = scmp.lt.s32.totalorder %s1544_s23, %s1538_s1 }
  0x94   : > { %1166 = vmatprep.subr.bf16.mxu1 %v1420_v10  ;;  %1222 = vmatprep.mubr.bf16.mxu0 %v1087_v26  ;;  %v587_v43 = vrot.slane %v585_v37, 4  ;;  %v1100_v45 = vcombine.high %v1933_v23, %v1938_v30  ;;  %v590_v48 = vrot.slane %v588_v40, 5  ;;  %v560_v49 = vld [vmem:[%s1929_s25 + $0x18] sm:$0x11]  ;;  %v580_v50 = vshll.u32 %v558_v46, 16  ;;  %v1445_v54 = vld [vmem:[#allocation5 + $0xf0] sm:$0xff]   ;;  %vm1953_vm3 = vmor %vm567_vm0, %vm568_vm1  ;;  %p1541_p13 = pneg %p1540_p3 }
  0x95   : > { %540 = vmatprep.mubr.bf16.mxu1 %v1098_v27  ;;  %v577_v39 = vor.u32 %v576_v35, %v573_v33  ;;  %v562_v51 = vld [vmem:[%s1929_s25 + $0x28] sm:$0x11]  ;;  %v594_v57 = vshll.u32 %v560_v49, 16  ;;  %v564_v58 = vld [vmem:[%s1929_s25 + $0x38] sm:$0x11]  ;;  %v601_v62 = vrot.slane %v599_v52, 4  ;;  %p1547_p11 = por %p1546_p9, %p1545_p7 }
  0x96   : > { %1213 = vmatpush3.bf16.msra.mxu0 %v1419_v9  ;;  %v591_v56 = vor.u32 %v590_v48, %v587_v43  ;;  %v608_v60 = vshll.u32 %v562_v51, 16  ;;  %v582_v61 = vrot.slane %v580_v50, 5  ;;  %v613_v63 = vshrl.u32 %v1938_v30, 16  ;;  %v1448_v24 = vld [vmem:[#allocation5 + $0x100] sm:$0xff]   ;;  %v566_v31 = vld [vmem:[%s1929_s25 + $0x48] sm:$0x11] }
  0x97   : > { %1167 = vmatpush3.bf16.msra.mxu1 %v1421_v11  ;;  %1214 = vmatprep.subr.bf16.mxu0 %v1422_v12  ;;  %v578_v47 = vrot.slane %v577_v39, 4  ;;  %v616_v0 = vshll.u32 %v1938_v30, 16  ;;  %v596_v2 = vrot.slane %v594_v57, 5  ;;  %v604_v3 = vrot.slane %v602_v59, 5  ;;  %v1451_v37 = vld [vmem:[#allocation5 + $0x118] sm:$0xff]   ;;  %p1548_p5 = pnand %p1547_p11, %p1541_p13 }
  0x98   : > { %1168 = vmatprep.subr.bf16.mxu1 %v1423_v13  ;;  %v592_v1 = vrot.slane %v591_v56, 4  ;;  %v610_v4 = vrot.slane %v608_v60, 5  ;;  %v615_v6 = vrot.slane %v613_v63, 4  ;;  %v622_v8 = vshll.u32 %v564_v58, 16 }
  0x99   : > { %v583_v5 = vsel %vm1953_vm3, %v578_v47, %v582_v61  ;;  %v618_v7 = vrot.slane %v616_v0, 5  ;;  %v1099_v9 = vcombine.low %v1933_v23, %v1938_v30  ;;  %v605_v11 = vor.u32 %v604_v3, %v601_v62 }
  0x9a   : > { %1215 = vmatpush3.bf16.msra.mxu0 %v1422_v12  ;;  %v597_v10 = vsel %vm1953_vm3, %v592_v1, %v596_v2  ;;  %v1447_v12 = vld [vmem:[#allocation5 + $0xf8] sm:$0xff]   ;;  %v630_v22 = vshll.u32 %v1941_v32, 16  ;;  %v636_v33 = vshll.u32 %v566_v31, 16 }
  0x9b   : > { %1169 = vmatpush3.bf16.msra.mxu1 %v1424_v14  ;;  %1216 = vmatprep.subr.bf16.mxu0 %v1425_v15  ;;  %v619_v13 = vor.u32 %v618_v7, %v615_v6  ;;  %v624_v14 = vrot.slane %v622_v8, 5 }
  0x9c   : > { %1170 = vmatprep.subr.bf16.mxu1 %v1426_v16  ;;  %v1446_v16 = vld [vmem:[#allocation5 + $0xd8] sm:$0xff]   ;;  %v632_v28 = vrot.slane %v630_v22, 5 }
  0x9e   : > { %1217 = vmatpush3.bf16.msra.mxu0 %v1425_v15  ;;  %v1125_v15 = vcombine.high %v583_v5, %v597_v10 }
  0x9f   : > { %1171 = vmatpush3.bf16.msra.mxu1 %v1427_v17  ;;  %1218 = vmatprep.subr.bf16.mxu0 %v1428_v18  ;;  %v1117_v17 = vcombine.low %v583_v5, %v597_v10  ;;  %v1141_v5 = vld [vmem:[#allocation7] ss:$0 sm:$0xff] }
  0xa0   : > { %1172 = vmatprep.subr.bf16.mxu1 %v1429_v19  ;;  %v620_v19 = vrot.slane %v619_v13, 4 }
  0xa2   : > { %1219 = vmatpush3.bf16.msra.mxu0 %v1428_v18  ;;  %v606_v18 = vrot.slane %v605_v11, 4  ;;  %v625_v23 = vsel %vm1953_vm3, %v620_v19, %v624_v14 }
  0xa3   : > { %1173 = vmatpush3.bf16.msra.mxu1 %v1430_v20  ;;  %1220 = vmatprep.subr.bf16.mxu0 %v1431_v21 }
  0xa4   : > { %1174 = vmatprep.subr.bf16.mxu1 %v1432_v25  ;;  %v611_v20 = vsel %vm1953_vm3, %v606_v18, %v610_v4 }
  0xa5   : > { %v1126_v25 = vcombine.high %v611_v20, %v625_v23  ;;  %v1118_v26 = vcombine.low %v611_v20, %v625_v23  ;;  %v1133_v30 = vcombine.low %v597_v10, %v611_v20 }
  0xa6   : > { %1221 = vmatpush3.bf16.msra.mxu0 %v1431_v21  ;;  %v627_v21 = vshrl.u32 %v1941_v32, 16 }
  0xa7   : > { %1175 = vmatpush3.bf16.msra.mxu1 %v1433_v29  ;;  %1238 = vmatprep.subr.bf16.mxu0 %v1439_v34  ;;  %v1449_v29 = vld [vmem:[#allocation5 + $0x108] sm:$0xff]  }
  0xa8   : > { %1226 = vmatprep.subr.bf16.mxu1 %v1438_v36  ;;  %v629_v27 = vrot.slane %v627_v21, 4 }
  0xa9   : > { %1223 = vmatmul.mubr.bf16.vlgmr.msra.gmra.mrb[0].mxu0 %v1088_v38 }
  0xaa   : > { %541 = vmatmul.mubr.bf16.vlgmr.msra.gmra.mrb[0].mxu1 %v1097_v41  ;;  %1239 = vmatpush3.bf16.msra.mxu0 %v1439_v34  ;;  %v633_v32 = vor.u32 %v632_v28, %v629_v27  ;;  %v1450_v34 = vld [vmem:[#allocation5 + $0x110] sm:$0xff]  }
  0xab   : > { %1227 = vmatpush3.bf16.msra.mxu1 %v1438_v36  ;;  %1240 = vmatprep.subr.bf16.mxu0 %v1441_v44  ;;  %v638_v36 = vrot.slane %v636_v33, 5 }
  0xac   : > { %1228 = vmatprep.subr.bf16.mxu1 %v1440_v42  ;;  %548 = vmatprep.mubr.bf16.mxu1 %v1100_v45  ;;  %v634_v35 = vrot.slane %v633_v32, 4 }
  0xad   : > { %1246 = vmatprep.mubr.msk.bf16.mxu0 %vm678_vm2, %v1125_v15 }
  0xae   : > { %1241 = vmatpush3.bf16.msra.mxu0 %v1441_v44  ;;  %v639_v38 = vsel %vm1953_vm3, %v634_v35, %v638_v36 }
  0xaf   : > { %1229 = vmatpush3.bf16.msra.mxu1 %v1440_v42  ;;  %1242 = vmatprep.subr.bf16.mxu0 %v1445_v54  ;;  %v1134_v39 = vcombine.low %v625_v23, %v639_v38 }
  0xb0   : > { %1230 = vmatprep.subr.bf16.mxu1 %v1444_v53 }
  0xb2   : > { %549 = vmatmul.mubr.bf16.gmra.mrb[4].mxu1 %v1099_v9  ;;  %1243 = vmatpush3.bf16.msra.mxu0 %v1445_v54 }
  0xb3   : > { %1231 = vmatpush3.bf16.msra.mxu1 %v1444_v53  ;;  %1244 = vmatprep.subr.bf16.mxu0 %v1447_v12 }
  0xb4   : > { %1232 = vmatprep.subr.bf16.mxu1 %v1446_v16  ;;  %1234 = vmatprep.mubr.msk.bf16.mxu1 %vm678_vm2, %v1117_v17 }
  0xb6   : > { %1245 = vmatpush3.bf16.msra.mxu0 %v1447_v12 }
  0xb7   : > { %1233 = vmatpush3.bf16.msra.mxu1 %v1446_v16  ;;  %1250 = vmatprep.subr.bf16.mxu0 %v1448_v24 }
  0xb9   : > { %1247 = vmatmul.mubr.msk.bf16.vlgmr.msra.gmra.mrb[4].mxu0 %vm678_vm2, %v1126_v25 }
  0xba   : > { %1235 = vmatmul.mubr.msk.bf16.vlgmr.msra.gmra.mrb[8].mxu1 %vm678_vm2, %v1118_v26  ;;  %1251 = vmatpush3.bf16.msra.mxu0 %v1448_v24 }
  0xbb   : > { %1252 = vmatprep.subr.bf16.mxu0 %v1449_v29  ;;  %1258 = vmatprep.mubr.msk.bf16.mxu0 %vm678_vm2, %v1133_v30 }
  0xbe   : > { %1253 = vmatpush3.bf16.msra.mxu0 %v1449_v29 }
  0xbf   : > { %1254 = vmatprep.subr.bf16.mxu0 %v1450_v34 }
  0xc2   : > { %1255 = vmatpush3.bf16.msra.mxu0 %v1450_v34 }
  0xc3   : > { %1256 = vmatprep.subr.bf16.mxu0 %v1451_v37 }
  0xc6   : > { %1257 = vmatpush3.bf16.msra.mxu0 %v1451_v37 }
  0xc9   : > { %1259 = vmatmul.mubr.msk.bf16.vlgmr.msra.gmra.mrb[4].mxu0 %vm678_vm2, %v1134_v39 }
 0x17c   : > { %v1224_v40 = vpop.f32.mrb[0].mxu0 }
 0x17d   : > { %v1176_v41 = vpop.f32.mrb[0].mxu1  ;;  %v383_v42 = vpop.f32.mrb[1].mxu0 }
 0x17e   : > { %v1177_v43 = vpop.f32.mrb[1].mxu1  ;;  %v1225_v44 = vpop.f32.mrb[2].mxu0 }
 0x17f   : > { %v1178_v45 = vadd.f32 %v1177_v43, %v1176_v41  ;;  %v1179_v46 = vpop.f32.mrb[2].mxu1  ;;  %v386_v47 = vpop.f32.mrb[3].mxu0 }
 0x180   : > { %v1180_v48 = vpop.f32.mrb[3].mxu1 }
 0x181   : > { %v1181_v49 = vadd.f32 %v1180_v48, %v1179_v46  ;;  %v543_v50 = vadd.f32 %v1178_v45, %v383_v42 }
 0x183   : > { %v546_v51 = vadd.f32 %v1181_v49, %v386_v47 }
 0x185   : > { %v1182_v52 = vpop.f32.mrb[4].mxu1 }
 0x186   : > { %v1183_v53 = vpop.f32.mrb[5].mxu1 }
 0x187   : > { %v1184_v54 = vadd.f32 %v1183_v53, %v1182_v52  ;;  %v1185_v55 = vpop.f32.mrb[6].mxu1 }
 0x188   : > { %v1186_v56 = vpop.f32.mrb[7].mxu1 }
 0x189   : > { %v1187_v57 = vadd.f32 %v1186_v56, %v1185_v55  ;;  %v551_v58 = vadd.f32 %v1224_v40, %v1184_v54 }
 0x18b   : > { %v554_v59 = vadd.f32 %v1225_v44, %v1187_v57 }
 0x18d   : > { %v1236_v60 = vpop.f32.mrb[8].mxu1 }
 0x18e   : > { %v736_v61 = vadd.f32 %v1236_v60, %v551_v58  ;;  %v719_v62 = vpop.f32.mrb[9].mxu1 }
 0x18f   : > { %v734_v63 = vadd.f32 %v719_v62, %v543_v50  ;;  %v1237_v0 = vpop.f32.mrb[10].mxu1 }
 0x190   : > { %v737_v1 = vadd.f32 %v1237_v0, %v554_v59  ;;  %v722_v2 = vpop.f32.mrb[11].mxu1 }
 0x191   : > { %v735_v3 = vadd.f32 %v722_v2, %v546_v51 }
 0x19c   : > { %v1260_v4 = vpop.f32.mrb[4].mxu0 }
 0x19d   : > { %v1264_v6 = vadd.f32 %v1260_v4, %v736_v61  ;;  %v910_v7 = vpop.f32.mrb[5].mxu0 }
 0x19e   : > { %v1267_v8 = vadd.f32 %v910_v7, %v734_v63  ;;  %v1261_v9 = vpop.f32.mrb[6].mxu0 }
 0x19f   : > { %v938_v10 = vadd.f32 %v1264_v6, %v1141_v5  ;;  %v1270_v11 = vadd.f32 %v1261_v9, %v737_v1  ;;  %v913_v12 = vpop.f32.mrb[7].mxu0 }
 0x1a0   : > { %v936_v13 = vadd.f32 %v1267_v8, %v1141_v5  ;;  %v1273_v14 = vadd.f32 %v913_v12, %v735_v3 }
 0x1a1   : > { %v942_v15 = vmax.f32 %v938_v10, 0.0  ;;  %v939_v16 = vadd.f32 %v1270_v11, %v1141_v5 }
 0x1a2   : > { %v940_v17 = vmax.f32 %v936_v13, 0.0  ;;  %v937_v18 = vadd.f32 %v1273_v14, %v1141_v5 }
 0x1a3   : > { %947 = vst.msk [vmem:[%s229_s8 + $0x10] sm:$0xff] %vm944_vm4, %v942_v15  ;;  %v943_v19 = vmax.f32 %v939_v16, 0.0 }
 0x1a4   : > { %945 = vst.msk [vmem:[%s229_s8] sm:$0xff] %vm944_vm4, %v940_v17  ;;  %v941_v20 = vmax.f32 %v937_v18, 0.0 }
 0x1a5   : > { %948 = vst.msk [vmem:[%s229_s8 + $0x18] sm:$0xff] %vm944_vm4, %v943_v19 }
 0x1a6   : > { %946 = vst.msk [vmem:[%s229_s8 + $0x8] sm:$0xff] %vm944_vm4, %v941_v20 }
 0x1a7   : > { %1551 = shalt.err (!%p1548_p5)
}
 0x1a8   : > { %s1552_s24 = scalar_lea.hbm %s1994_s12, 512  ;;  %s1556_s27 = scalar_lea.hbm %s2064_s3, 2048 }
 0x1a9   : > { %p1553_p8 = scmp.ne.s32.totalorder %s1994_s12, %s1552_s24  ;;  %p1557_p6 = scmp.lt.u32.totalorder %s1994_s12, %s2064_s3 }
 0x1aa   : > { %p1558_p10 = scmp.lt.u32.totalorder %s1556_s27, %s1552_s24  ;;  %p1560_p4 = scmp.lt.u32.totalorder %s1552_s24, %s1994_s12 }
 0x1ab   : > { %p1554_p12 = pnand %p1553_p8, %p2096_p1 }
 0x1ac   : > { %p1559_p0 = por %p1558_p10, %p1557_p6 }
 0x1ad   : > { %p1555_p2 = pneg %p1554_p12 }
 0x1ae   : > { %p1561_p3 = por %p1560_p4, %p1559_p0 }
 0x1b0   : > { %p1562_p13 = pnand %p1561_p3, %p1555_p2 }
 0x1b2   : > { %1565 = shalt.err (!%p1562_p13)
}
 0x1b3   : > { %s1674_s7 = smov 128   ;;  %s1675_s15 = smov 8  }
 0x1b4   : > { %1291 = dma.vmem_to_hbm [thread:$0]  (%p2096_p1), %s1988_s4, 512, %s1994_s12, %s2000_s6, %s1674_s7, %s1674_s7, %s1675_s15  }
 0x1b5 PF: > { %s2097_s8 = sld [smem:[#allocation12_spill]]  ;;  %s2098_s18 = sld [smem:[#allocation14_spill]] }
 0x1b6   : > { %p1313_p7 = scmp.ge.s32.totalorder %s1664_s22, 2 }
 0x1bb   : > { %s980_s19 = sand.u32 1, %s2097_s8   ;;  %p2099_p9 = scmp.ne.s32.totalorder %s2098_s18, 0 }
 0x1bc   : > { %s981_s5 = scalar_lea.sflag [#allocation4], %s980_s19 }
 0x1bd   : > { %p1305_p11 = pnand %p1313_p7, %p2099_p9 }
 0x1bf   : > { %1619 = dma.done.wait (!%p1305_p11), %s981_s5, 512  }
 0x1c0   : > { %1621 = vsyncadd (!%p1305_p11), %s981_s5, 4294966784  ;;  %s20_s22 = sadd.s32 1, %s1664_s22   ;;  %s2100_s18 = sld [smem:[#allocation13_spill]] }
 0x1c1   : > { %p17_p5 = scmp.ge.s32.totalorder %s20_s22, 6   ;;  %s2101_s20 = sld [smem:[#allocation15_spill]] }
 0x1c2   : > { %s2102_s12 = smov %s1628_s13  ;;  %s2103_s13 = smov %s1632_s14 }
 0x1c3   : > { %s2104_s14 = smov %s1872_s2  ;;  %s2105_s15 = smov %s1640_s16 }
 0x1c4   : > { %s2106_s16 = smov %s1644_s17  ;;  %s2107_s17 = smov %s1867_s29 }
 0x1c5   : > { %s2108_s19 = smov %s1660_s21  ;;  %s2109_s21 = smov %s2115_s10 }
 0x1c6   :  { %19 = sbr.rel (!%p17_p5) target bundleno = 13 (0xd), region = 86 }
 0x1cd   :  { %986 = vsyncpa [#allocation3], 1 }
 0x1ce   :  { %988 = vsyncpa [#allocation3 + $0x1], 1 }
 0x1cf   :  { %989 = vsyncpa [#allocation6], 1 }
 0x1d0   :  { %990 = vsyncpa [#allocation4], 1 }
 0x1d1   :  { %992 = vsyncpa [#allocation4 + $0x1], 1 }

</bundles_post_ra>
